<compile_context>
chip_gen: v5e
topology: v5e:2x2
jax: 0.10.0
libtpu: 0.0.40
codegen_flags: <defaults>
</compile_context>

<pallas_src>
import jax
import jax.numpy as jnp
from jax.experimental import pallas as pl
from jax.experimental.pallas import tpu as pltpu


def _round_up(x, m):
    return ((x + m - 1) // m) * m


def _classifier_kernel(src_ref, w_ref, bias_ref, out_ref):
    # src_ref:  (tm, D)  f32 activations tile -> bf16 cast on the VPU (free vs.
    #           a separate wrapper-side XLA cast pass over src in HBM)
    # w_ref:    (D, tn)  bf16 tile of the prepared (permuted + transposed) table
    # bias_ref: (1, tn)  f32 bias tile
    # out_ref:  (tm, tn) logits tile (f32 or bf16)
    a = src_ref[...].astype(jnp.bfloat16)
    acc = jnp.dot(a, w_ref[...], preferred_element_type=jnp.float32)  # MXU, f32 acc
    out_ref[...] = (acc + bias_ref[...]).astype(out_ref.dtype)


def prepare_classifier_weights(block_weights, idx2bidx, dtype=jnp.bfloat16):
    """One-time (weight-load time) prep, fully hoisted out of the forward path:
    concat block tables, apply the idx2bidx output-column permutation as a row
    gather, pre-transpose to (D, V) so the kernel gets MXU-native (K, N) tiles
    that are lane-dense on the vocab axis, and quantize."""
    w_all = jnp.concatenate(block_weights, axis=0)      # (V, D) block-serialized rows
    w_perm = jnp.take(w_all, idx2bidx, axis=0)          # == ret[:, :, idx2bidx]
    # TODO(synk): fp8 (v7x) / int8 + per-row-scale (v6e) weight variants would
    # slot in here (offline path), with the scale folded into the bias-add epilogue.
    return jnp.transpose(w_perm).astype(dtype)           # (D, V)


def blockwise_embedding_classifier(src, w_t, bias, *, tm=256, tn=512,
                                   out_dtype=jnp.float32):
    """src: (B, S, D) f32; w_t: (D, V) prepared table (bf16); bias: (V,) f32.

    Defaults (tm=256, tn=512) are safe on v7x's 64 MiB VMEM; on v5e/v6e
    (128 MiB) tn=1024 amortizes per-step overhead better for large V.
    """
    B, S, D = src.shape
    Dw, V = w_t.shape
    assert Dw == D, "prepared weight table must be (D, V)"
    M = B * S

    # Clamp tiles to the (rounded-up) problem size; lane dims stay multiples of
    # 128 and sublane dims multiples of 8 so partial edge blocks are legal.
    tn = min(tn, _round_up(V, 128))
    tm = min(tm, _round_up(M, 8))

    # cdiv grid + unpadded out_shape: no per-call padding, no output slice.
    # Vocab axis innermost -> src tile is invariant across it (no re-DMA).
    grid = (pl.cdiv(M, tm), pl.cdiv(V, tn))

    src2d = src.reshape(M, D)                       # metadata-only reshape
    bias2d = bias.astype(jnp.float32).reshape(1, V)

    out_bytes = jnp.dtype(out_dtype).itemsize
    cost = pl.CostEstimate(
        flops=2 * M * D * V,
        transcendentals=0,
        bytes_accessed=(M * D * src.dtype.itemsize + V * D * w_t.dtype.itemsize
                        + M * V * out_bytes + V * 4),
    )

    # VMEM accounting with lane (->128) and sublane padding, double-buffered.
    d_lane = _round_up(D, 128)      # src tile lane padding
    d_sub = _round_up(D, 16)        # bf16 weight tile sublane packing
    vmem_need = 2 * (tm * d_lane * 4          # src tile (f32)
                     + d_sub * tn * 2         # weight tile (bf16)
                     + 8 * tn * 4             # bias tile (sublane-padded)
                     + tm * tn * out_bytes)   # output tile
    vmem_limit = int(max(vmem_need + (1 << 20), 32 * 1024 * 1024))
    # TODO(synk): for very large D (>= ~8K) on v7x, add a K grid axis marked
    # "arbitrary" with an f32 accumulator scratch + pl.when init/finalize to
    # bound the double-buffered footprint.

    out2d = pl.pallas_call(
        _classifier_kernel,
        out_shape=jax.ShapeDtypeStruct((M, V), out_dtype),
        grid=grid,
        in_specs=[
            pl.BlockSpec((tm, D), lambda i, j: (i, 0)),   # src tile (reused across vocab axis)
            pl.BlockSpec((D, tn), lambda i, j: (0, j)),   # lane-dense weight tile
            pl.BlockSpec((1, tn), lambda i, j: (0, j)),   # bias tile
        ],
        out_specs=pl.BlockSpec((tm, tn), lambda i, j: (i, j)),
        compiler_params=pltpu.CompilerParams(
            dimension_semantics=("parallel", "parallel"),
            vmem_limit_bytes=vmem_limit,
        ),
        cost_estimate=cost,
    )(src2d, w_t, bias2d)

    return out2d.reshape(B, S, V)


if __name__ == "__main__":
    key = jax.random.PRNGKey(0)
    k_src, k_perm, k_bias, *k_blocks = jax.random.split(key, 8)

    # Module config (small; deliberately non-tile-aligned V and M to exercise
    # the partial edge-block path):
    #   block_sizes = [(num, size), ...]; embedding tables are (num, input_dim).
    input_dim = 32
    block_sizes = [(128, 32), (100, 16), (60, 8)]
    V = sum(num for num, _ in block_sizes)              # 288 total vocab
    batch, seq = 2, 9                                   # M = 18

    # Deterministic synthetic parameters (embedding_initializer=normal_,
    # bias_initializer=uniform_).
    block_weights = [
        jax.random.normal(k_blocks[i], (num, input_dim), dtype=jnp.float32)
        for i, (num, _) in enumerate(block_sizes)
    ]
    bias = jax.random.uniform(k_bias, (V,), dtype=jnp.float32)

    # idx2bidx buffer: deterministic permutation vocab_idx -> block-serialized idx.
    # TODO(synk): the assignment-list -> idx2bidx construction in __init__ is
    # host-side Python bookkeeping, not a kernel; we take the buffer directly
    # as the module does.
    idx2bidx = jax.random.permutation(k_perm, V).astype(jnp.int32)

    # Input activations.
    src = jax.random.normal(k_src, (batch, seq, input_dim), dtype=jnp.float32)

    # One-time weight prep (permute + transpose + quantize, off the hot path).
    w_t = prepare_classifier_weights(block_weights, idx2bidx, dtype=jnp.bfloat16)

    out = blockwise_embedding_classifier(src, w_t, bias)
    out = jax.block_until_ready(out)

    # Reference (pure JAX, mirrors the PyTorch forward loop + concat + gather +
    # bias), with the same bf16 input quantization / f32 accumulation as the
    # kernel.  NOTE: bf16-quantized inputs mean logits differ from a pure-f32
    # PyTorch run beyond ~1e-3; flagged for downstream consumers.
    w_all = jnp.concatenate(block_weights, axis=0)
    src_q = src.astype(jnp.bfloat16).astype(jnp.float32)
    w_q = w_all.astype(jnp.bfloat16).astype(jnp.float32)
    ref = jnp.einsum("bsd,vd->bsv", src_q, w_q)
    ref = ref[:, :, idx2bidx] + bias

    assert out.shape == (batch, seq, V)
    assert jnp.allclose(out, ref, rtol=1e-3, atol=1e-3)
    print("KERNEL_OK")
</pallas_src>

<mosaic_0001>
module attributes {stable_mosaic.version = 11 : i64} {
  func.func @_classifier_kernel(%arg0: i32, %arg1: i32, %arg2: memref<24x32xf32, #tpu.memory_space<vmem>>, %arg3: memref<32x384xbf16, #tpu.memory_space<vmem>>, %arg4: memref<1x384xf32, #tpu.memory_space<vmem>>, %arg5: memref<24x384xf32, #tpu.memory_space<vmem>>) attributes {dimension_semantics = [#tpu.dimension_semantics<parallel>, #tpu.dimension_semantics<parallel>], iteration_bounds = array<i64: 1, 1>, scalar_prefetch = 0 : i64, scratch_operands = 0 : i64, tpu.core_type = #tpu.core_type<tc>, window_params = [{transform_indices = @transform_0, window_bounds = array<i64: 24, 32>}, {transform_indices = @transform_1, window_bounds = array<i64: 32, 384>}, {transform_indices = @transform_2, window_bounds = array<i64: 1, 384>}, {transform_indices = @transform_3, window_bounds = array<i64: 24, 384>}]} {
    %c0 = arith.constant 0 : index
    %c0_0 = arith.constant 0 : index
    %0 = vector.load %arg2[%c0, %c0_0] : memref<24x32xf32, #tpu.memory_space<vmem>>, vector<24x32xf32>
    %1 = arith.truncf %0 : vector<24x32xf32> to vector<24x32xbf16>
    %c0_1 = arith.constant 0 : index
    %c0_2 = arith.constant 0 : index
    %2 = vector.load %arg3[%c0_1, %c0_2] : memref<32x384xbf16, #tpu.memory_space<vmem>>, vector<32x384xbf16>
    %cst = arith.constant dense<0.000000e+00> : vector<24x384xf32>
    %3 = tpu.matmul %1, %2, %cst {dimension_numbers = #tpu.dot_dimension_numbers<[1], [0], [0], [1], [0, 0, 1, 1], [], []>} : vector<24x32xbf16>, vector<32x384xbf16>, vector<24x384xf32> -> vector<24x384xf32>
    %c0_3 = arith.constant 0 : index
    %c0_4 = arith.constant 0 : index
    %4 = vector.load %arg4[%c0_3, %c0_4] : memref<1x384xf32, #tpu.memory_space<vmem>>, vector<1x384xf32>
    %5 = vector.broadcast %4 : vector<1x384xf32> to vector<24x384xf32>
    %6 = arith.addf %3, %5 : vector<24x384xf32>
    %c0_5 = arith.constant 0 : index
    %c0_6 = arith.constant 0 : index
    %7 = vector.load %arg5[%c0_5, %c0_6] : memref<24x384xf32, #tpu.memory_space<vmem>>, vector<24x384xf32>
    tpu.vector_store %arg5[%c0_5, %c0_6], %6 {strides = array<i32>} : memref<24x384xf32, #tpu.memory_space<vmem>>, vector<24x384xf32>,
    return
  }
  func.func @transform_0(%arg0: i32, %arg1: i32) -> (i32, i32) {
    %c0_i32 = arith.constant 0 : i32
    %c0_i32_0 = arith.constant 0 : i32
    return %arg0, %c0_i32 : i32, i32
  }
  func.func @transform_1(%arg0: i32, %arg1: i32) -> (i32, i32) {
    %c0_i32 = arith.constant 0 : i32
    %c0_i32_0 = arith.constant 0 : i32
    return %c0_i32, %arg1 : i32, i32
  }
  func.func @transform_2(%arg0: i32, %arg1: i32) -> (i32, i32) {
    %c0_i32 = arith.constant 0 : i32
    %c0_i32_0 = arith.constant 0 : i32
    return %c0_i32, %arg1 : i32, i32
  }
  func.func @transform_3(%arg0: i32, %arg1: i32) -> (i32, i32) {
    %c0_i32 = arith.constant 0 : i32
    return %arg0, %arg1 : i32, i32
  }
}

</mosaic_0001>

<bundles_post_ra>
// kernel: tpu_custom_call.1
= control target key start
LH: loop header
LB: loop body
LE: loop exit
PB: predicated region body
PF: predicated region fallthrough
CT: control target
= control target key end

     0   :  { %8 = vsyncpa [#allocation3], 0  ;;  %s396_s0 = inlined_call_operand.hbm [shape: f32[18,32], index: 0, kind: input, shape index: {}]   ;;  %s397_s1 = inlined_call_operand.hbm [shape: bf16[32,288], index: 1, kind: input, shape index: {}]   ;;  %s398_s2 = inlined_call_operand.hbm [shape: f32[1,288], index: 2, kind: input, shape index: {}]   ;;  %s399_s3 = inlined_call_operand.hbm [shape: f32[18,288], index: 3, kind: output, shape index: {}]  }
   0x1   :  { %9 = vsyncpa [#allocation6], 0  ;;  %s28_s14 = sshll.u32 %s397_s1, 4  ;;  %s29_s14 = int_to_ptr.hbm [resolvable:$true] %s28_s14 }
   0x2   :  { %10 = vsyncpa [#allocation4], 0  ;;  %s354_s15 = smov [#allocation5]   ;;  %s15_s19 = sshll.u32 %s396_s0, 4  ;;  %s16_s19 = int_to_ptr.hbm [resolvable:$true] %s15_s19 }
   0x3   :  { %s30_s16 = sshll.u32 %s354_s15, 4  ;;  %s355_s20 = smov 192   ;;  %s31_s16 = int_to_ptr.vmem [resolvable:$true] %s30_s16 }
   0x4   :  { %s356_s21 = smov 12   ;;  %s357_s22 = smov [#allocation2]  }
   0x5   :  { %36 = dma.hbm_to_vmem [thread:$0]  %s29_s14, 768, %s31_s16, [#allocation6], %s355_s20, %s355_s20, %s356_s21  }
   0x6   :  { %s17_s23 = sshll.u32 %s357_s22, 4  ;;  %s358_s24 = smov 128   ;;  %s18_s23 = int_to_ptr.vmem [resolvable:$true] %s17_s23 }
   0x7   :  { %s359_s25 = smov 8   ;;  %s42_s27 = sshll.u32 %s398_s2, 4  ;;  %s43_s27 = int_to_ptr.hbm [resolvable:$true] %s42_s27 }
   0x8   :  { %23 = dma.hbm_to_vmem [thread:$0]  %s16_s19, 384, %s18_s23, [#allocation3], %s358_s24, %s358_s24, %s359_s25  }
   0x9   :  { %s360_s28 = smov [#allocation7]  }
   0xa   :  { %s44_s29 = sshll.u32 %s360_s28, 4  ;;  %s45_s29 = int_to_ptr.vmem [resolvable:$true] %s44_s29 }
   0xb   :  { %47 = dma.hbm_to_vmem [thread:$0]  %s43_s27, 48, %s45_s29, [#allocation6]  }
   0xc   :  { %348 = dma.done.wait [#allocation3], 384  }
   0xd   :  { %349 = vsyncadd [#allocation3], 4294966912 }
   0xe   :  { %350 = dma.done.wait [#allocation6], 816  }
   0xf   :  { %351 = vsyncadd [#allocation6], 4294966480  ;;  %v237_v0 = vld [vmem:[#allocation5 + $0x1c] sm:$0xf]  ;;  %v220_v1 = vld [vmem:[#allocation5 + $0x24] sm:$0xf0] }
  0x10   :  { %v226_v2 = vld [vmem:[#allocation5 + $0x20] sm:$0xf]  ;;  %v223_v3 = vor.u32 %v237_v0, %v220_v1  ;;  %v239_v4 = vld [vmem:[#allocation5 + $0x28] sm:$0xf0]  ;;  %v234_v5 = vld [vmem:[#allocation5 + $0x4] sm:$0xf] }
  0x11   :  { %v208_v6 = vld [vmem:[#allocation5 + $0xc] sm:$0xf0]  ;;  %v227_v7 = vor.u32 %v239_v4, %v226_v2  ;;  %v214_v8 = vld [vmem:[#allocation5 + $0x8] sm:$0xf]  ;;  %v236_v9 = vld [vmem:[#allocation5 + $0x10] sm:$0xf0] }
  0x12   :  { %v61_v10 = vld [vmem:[#allocation2] sm:$0xff]  ;;  %145 = vmatpush.bf16.msra.mxu1 %v223_v3  ;;  %v211_v11 = vor.u32 %v234_v5, %v208_v6  ;;  %v62_v12 = vld [vmem:[#allocation2 + $0x8] sm:$0xff]  ;;  %v218_v13 = vld [vmem:[#allocation5 + $0x18] sm:$0xf]  ;;  %v215_v15 = vor.u32 %v236_v9, %v214_v8  ;;  %vm114_vm0 = vcmask 261120   ;;  %s361_s0 = smov [#allocation8]  }
  0x13   :  { %v238_v14 = vld [vmem:[#allocation5 + $0x20] sm:$0xf0]  ;;  %163 = vmatpush.bf16.msra.mxu2 %v227_v7  ;;  %v206_v17 = vld [vmem:[#allocation5] sm:$0xf]  ;;  %v235_v18 = vld [vmem:[#allocation5 + $0x8] sm:$0xf0]  ;;  %v64_v19 = vpack.c.bf16 %v62_v12, %v61_v10 }
  0x14   :  { %v219_v16 = vor.u32 %v238_v14, %v218_v13  ;;  %v207_v20 = vor.u32 %v235_v18, %v206_v17  ;;  %v63_v21 = vld [vmem:[#allocation2 + $0x10] sm:$0xff]  ;;  %v74_v23 = vld [vmem:[#allocation7] sm:$0x7]  ;;  %s188_s2 = sshll.u32 %s361_s0, 4  ;;  %s190_s5 = sshll.u32 %s399_s3, 4  ;;  %s189_s2 = int_to_ptr.vmem [resolvable:$true] %s188_s2  ;;  %s191_s5 = int_to_ptr.hbm [resolvable:$true] %s190_s5 }
  0x15   :  { %v65_v22 = vpack.c.bf16 %v63_v21, %v63_v21  ;;  %v77_v24 = vperm.slane %v74_v23, 1  ;;  %v76_v27 = vperm.slane %v74_v23, 0  ;;  %v78_v28 = vperm.slane %v74_v23, 2  ;;  %s362_s6 = smov 384   ;;  %s363_s7 = smov 24  }
  0x16   :  { %240 = vmatpush.bf16.msra.mxu3 %v219_v16  ;;  %127 = vmatpush.bf16.msra.mxu0 %v219_v16 }
  0x17   :  { %146 = vmatpush.bf16.msra.mxu1 %v211_v11  ;;  %164 = vmatpush.bf16.msra.mxu2 %v215_v15 }
  0x1a   :  { %230 = vmatmul.msk.bf16.vlgmr.msra.gmra.mxu1 %vm114_vm0, %v64_v19  ;;  %241 = vmatpush.bf16.msra.mxu3 %v207_v20 }
  0x1b   :  { %232 = vmatmul.msk.bf16.vlgmr.msra.gmra.mxu2 %vm114_vm0, %v64_v19  ;;  %128 = vmatpush.bf16.msra.mxu0 %v207_v20 }
  0x1d   :  { %229 = vmatmul.msk.bf16.vlgmr.msra.gmra.mxu3 %vm114_vm0, %v65_v22 }
  0x1e   :  { %228 = vmatmul.msk.bf16.vlgmr.msra.gmra.mxu0 %vm114_vm0, %v64_v19 }
  0x2a   :  { %231 = vmatmul.msk.bf16.gmra.mxu1 %vm114_vm0, %v65_v22 }
  0x2b   :  { %233 = vmatmul.msk.bf16.gmra.mxu2 %vm114_vm0, %v65_v22 }
  0x97   :  { %v148_v25 = vpop.f32.mrf.mxu1 }
  0x98   :  { %v149_v26 = vadd.f32 %v148_v25, %v77_v24 }
  0x9a   :  { %176 = vst [vmem:[#allocation8 + $0x8] sm:$0xff] %v149_v26 }
  0x9b   :  { %v130_v29 = vpop.f32.mrf.mxu0 }
  0x9c   :  { %v131_v30 = vadd.f32 %v130_v29, %v76_v27 }
  0x9e   :  { %v166_v31 = vpop.f32.mrf.mxu2  ;;  %175 = vst [vmem:[#allocation8] sm:$0xff] %v131_v30 }
  0x9f   :  { %v167_v32 = vadd.f32 %v166_v31, %v78_v28  ;;  %v150_v33 = vpop.f32.mrf.mxu1 }
  0xa0   :  { %v151_v34 = vadd.f32 %v150_v33, %v77_v24  ;;  %v135_v35 = vpop.f32.mrf.mxu3 }
  0xa1   :  { %177 = vst [vmem:[#allocation8 + $0x10] sm:$0xff] %v167_v32  ;;  %v136_v36 = vadd.f32 %v135_v35, %v76_v27 }
  0xa2   :  { %179 = vst [vmem:[#allocation8 + $0x20] sm:$0xff] %v151_v34 }
  0xa3   :  { %181 = vst [vmem:[#allocation8 + $0x30] sm:$0xff] %v136_v36  ;;  %v132_v37 = vpop.f32.mrf.mxu0 }
  0xa4   :  { %v133_v38 = vadd.f32 %v132_v37, %v76_v27 }
  0xa6   :  { %v168_v39 = vpop.f32.mrf.mxu2  ;;  %178 = vst [vmem:[#allocation8 + $0x18] sm:$0xff] %v133_v38 }
  0xa7   :  { %v169_v40 = vadd.f32 %v168_v39, %v78_v28  ;;  %v153_v41 = vpop.f32.mrf.mxu1 }
  0xa8   :  { %v154_v42 = vadd.f32 %v153_v41, %v77_v24  ;;  %v137_v43 = vpop.f32.mrf.mxu3 }
  0xa9   :  { %180 = vst [vmem:[#allocation8 + $0x28] sm:$0xff] %v169_v40 }
  0xaa   :  { %182 = vst [vmem:[#allocation8 + $0x38] sm:$0xff] %v154_v42 }
  0xae   :  { %v171_v44 = vpop.f32.mrf.mxu2 }
  0xaf   :  { %v172_v45 = vadd.f32 %v171_v44, %v78_v28  ;;  %v155_v46 = vpop.f32.mrf.mxu1 }
  0xb1   :  { %183 = vst [vmem:[#allocation8 + $0x40] sm:$0xff] %v172_v45 }
  0xb2   :  { %196 = dma.vmem_to_hbm [thread:$0]  %s189_s2, 1152, %s191_s5, [#allocation4], %s362_s6, %s362_s6, %s363_s7  }
  0xb6   :  { %v173_v47 = vpop.f32.mrf.mxu2 }
  0xb7   :  { %352 = dma.done.wait [#allocation4], 1152  }
  0xb8   :  { %353 = vsyncadd [#allocation4], 4294966144 }
  0xb9   :  { %201 = vsyncpa [#allocation3], 1 }
  0xba   :  { %202 = vsyncpa [#allocation6], 1 }
  0xbb   :  { %203 = vsyncpa [#allocation4], 1 }

</bundles_post_ra>
